<compile_context>
chip_gen: v6e
topology: v6e:2x2x1
jax: 0.10.0
libtpu: 0.0.40
codegen_flags: <defaults>
</compile_context>

<pallas_src>
import functools

import numpy as np
import jax
import jax.numpy as jnp
from jax import lax
from jax.experimental import pallas as pl
from jax.experimental.pallas import tpu as pltpu


LANE = 128  # lane-dense output slab width


# ----------------------------------------------------------------------------
# Pallas kernel: full LSTM rollout + fused actor/critic head, all in VMEM.
# ----------------------------------------------------------------------------
def a2c_lstm_kernel(num_actions,
                    x_ref, w_ih_ref, w_hh_ref, b_ref, h0_ref, c0_ref,
                    w_head_ref, b_head_ref,
                    out_ref, hT_ref, cT_ref,
                    gx_ref, h_all_ref):
    T = x_ref.shape[0]
    H = h0_ref.shape[1]
    P = out_ref.shape[1]
    A = num_actions

    w_hh = w_hh_ref[...]                                   # (H, 4H), hoisted load

    # ---- hoisted input projection (+ bias): one matmul for all T steps -----
    gx_ref[...] = (jnp.dot(x_ref[...], w_ih_ref[...],
                           preferred_element_type=jnp.float32)
                   + b_ref[...])                           # (T, 4H)

    # ---- recurrence: only h @ w_hh + gate math stays on the serial chain ---
    def step(t, carry):
        h, c = carry                                       # each (1, H)
        gates = (gx_ref[pl.ds(t, 1), :]
                 + jnp.dot(h, w_hh, preferred_element_type=jnp.float32))  # (1, 4H)

        # whole-vreg nonlinearities, then slice (2 transcendentals, not 4)
        sig = jax.nn.sigmoid(gates)
        tnh = jnp.tanh(gates)
        i_g = sig[:, 0:H]
        f_g = sig[:, H:2 * H]
        g_g = tnh[:, 2 * H:3 * H]
        o_g = sig[:, 3 * H:4 * H]

        c_new = f_g * c + i_g * g_g
        h_new = o_g * jnp.tanh(c_new)

        h_all_ref[pl.ds(t, 1), :] = h_new                  # stash for batched heads
        return (h_new, c_new)

    h_final, c_final = lax.fori_loop(0, T, step,
                                     (h0_ref[...], c0_ref[...]),
                                     unroll=True)
    hT_ref[...] = h_final
    cT_ref[...] = c_final

    # ---- batched heads: one (T,H)x(H,P) matmul, softmax over first A lanes -
    head = (jnp.dot(h_all_ref[...], w_head_ref[...],
                    preferred_element_type=jnp.float32)
            + b_head_ref[...])                             # (T, P)

    lane = lax.broadcasted_iota(jnp.int32, (T, P), 1)
    act_mask = lane < A
    neg = jnp.float32(-1e30)

    logits = jnp.where(act_mask, head, neg)
    m = jnp.max(logits, axis=-1, keepdims=True)
    e = jnp.exp(logits - m)                                # non-action lanes -> 0
    s = jnp.sum(e, axis=-1, keepdims=True)
    dist = e * pl.reciprocal(s, approx=True)               # EUP vrcp

    val_col = jnp.where(lane == A, head, 0.0)              # critic value in lane A

    # single lane-dense (T, 128) store: [dist | value | zero pad]
    out_ref[...] = dist + val_col


def a2c_lstm_forward(x, params, num_actions):
    """Runs the whole forward pass inside a single Pallas call (everything fits VMEM)."""
    T, _ = x.shape
    H = params["h0"].shape[1]
    A = num_actions
    P = LANE
    assert A + 1 <= P, "fused head assumes num_actions + 1 <= 128"

    # Fuse actor + critic into one lane-padded head (done once, wrapper-side).
    w_head = jnp.zeros((H, P), jnp.float32)
    w_head = w_head.at[:, :A].set(params["w_actor"])
    w_head = w_head.at[:, A:A + 1].set(params["w_critic"])
    b_head = jnp.zeros((1, P), jnp.float32)
    b_head = b_head.at[:, :A].set(params["b_actor"])
    b_head = b_head.at[:, A:A + 1].set(params["b_critic"])

    def vspec():
        return pl.BlockSpec(memory_space=pltpu.MemorySpace.VMEM)

    out_shape = (
        jax.ShapeDtypeStruct((T, P), jnp.float32),   # [action_dist | value | pad]
        jax.ShapeDtypeStruct((1, H), jnp.float32),   # h_T
        jax.ShapeDtypeStruct((1, H), jnp.float32),   # c_T
    )

    out_slab, h_t, c_t = pl.pallas_call(
        functools.partial(a2c_lstm_kernel, A),
        out_shape=out_shape,
        in_specs=[vspec() for _ in range(8)],
        out_specs=tuple(vspec() for _ in range(3)),
        scratch_shapes=[pltpu.VMEM((T, 4 * H), jnp.float32),   # hoisted x @ W_ih + b
                        pltpu.VMEM((T, H), jnp.float32)],      # per-step hidden states
    )(x,
      params["w_ih"], params["w_hh"], params["b"],
      params["h0"], params["c0"],
      w_head, b_head)

    # TODO(synk): for multi-sequence batches on v7x, add a leading "parallel"
    # grid axis instead of calling this single-sequence kernel per rollout.
    dist = out_slab[:, :A]
    value = out_slab[:, A:A + 1]
    return dist, value, h_t, c_t


# ----------------------------------------------------------------------------
# Deterministic parameter construction (mirrors the module's __init__ shapes).
# ----------------------------------------------------------------------------
def ortho_init_np(shape, scale, rng):
    """NumPy port of baselines' ortho_init for a torch Linear weight (out, in)."""
    flat_shape = (shape[1], shape[0])
    a = rng.normal(0.0, 1.0, flat_shape)
    u, _, vt = np.linalg.svd(a, full_matrices=False)
    q = u if u.shape == flat_shape else vt.T
    q = q.T.reshape(shape)
    return (scale * q).astype(np.float32)


def make_params(input_dim, hidden, num_actions, seed=0):
    rng = np.random.default_rng(seed)
    k = 1.0 / np.sqrt(hidden)

    # LSTM weights (torch layout (4H, D) / (4H, H)) then transpose for x @ W
    w_ih_t = rng.uniform(-k, k, (4 * hidden, input_dim)).astype(np.float32)
    w_hh_t = rng.uniform(-k, k, (4 * hidden, hidden)).astype(np.float32)
    b_ih = rng.uniform(-k, k, (4 * hidden,)).astype(np.float32)
    b_hh = rng.uniform(-k, k, (4 * hidden,)).astype(np.float32)

    w_actor_t = ortho_init_np((num_actions, hidden), 0.01, rng)   # (A, H)
    w_critic_t = ortho_init_np((1, hidden), 1.0, rng)             # (1, H)

    h0 = rng.standard_normal((1, hidden)).astype(np.float32)
    c0 = rng.standard_normal((1, hidden)).astype(np.float32)

    return {
        "w_ih": jnp.asarray(w_ih_t.T),                     # (D, 4H)
        "w_hh": jnp.asarray(w_hh_t.T),                     # (H, 4H)
        "b": jnp.asarray((b_ih + b_hh)[None, :]),          # (1, 4H)
        "h0": jnp.asarray(h0),
        "c0": jnp.asarray(c0),
        "w_actor": jnp.asarray(w_actor_t.T),               # (H, A)
        "b_actor": jnp.zeros((1, num_actions), jnp.float32),
        "w_critic": jnp.asarray(w_critic_t.T),             # (H, 1)
        "b_critic": jnp.zeros((1, 1), jnp.float32),
    }


# ----------------------------------------------------------------------------
# Pure-JAX reference (for a correctness check).
# ----------------------------------------------------------------------------
def ref_forward(x, p):
    H = p["h0"].shape[1]

    def cell(carry, x_t):
        h, c = carry
        x_t = x_t[None, :]
        gates = x_t @ p["w_ih"] + h @ p["w_hh"] + p["b"]
        i = jax.nn.sigmoid(gates[:, :H])
        f = jax.nn.sigmoid(gates[:, H:2 * H])
        g = jnp.tanh(gates[:, 2 * H:3 * H])
        o = jax.nn.sigmoid(gates[:, 3 * H:])
        c = f * c + i * g
        h = o * jnp.tanh(c)
        return (h, c), h[0]

    (hT, cT), hs = lax.scan(cell, (p["h0"], p["c0"]), x)
    dist = jax.nn.softmax(hs @ p["w_actor"] + p["b_actor"], axis=-1)
    val = hs @ p["w_critic"] + p["b_critic"]
    return dist, val, hT, cT


# ----------------------------------------------------------------------------
if __name__ == "__main__":
    SEQ = 8
    STATE_DIM = 18
    NUM_ACTIONS = 4
    HIDDEN = 32          # config['mem-units']
    INPUT_DIM = STATE_DIM + NUM_ACTIONS + 1 + 1   # state ++ p_action ++ p_reward ++ timestep

    key = jax.random.PRNGKey(0)
    k1, k2, k3, k4 = jax.random.split(key, 4)
    state = jax.random.normal(k1, (SEQ, STATE_DIM), jnp.float32)
    p_action = jax.nn.one_hot(
        jax.random.randint(k2, (SEQ,), 0, NUM_ACTIONS), NUM_ACTIONS, dtype=jnp.float32)
    p_reward = jax.random.normal(k3, (SEQ, 1), jnp.float32)
    timestep = jnp.arange(SEQ, dtype=jnp.float32)[:, None] / SEQ

    # glue: concatenation of the inputs (torch.cat(..., dim=-1))
    x = jnp.concatenate([state, p_action, p_reward, timestep], axis=-1)

    params = make_params(INPUT_DIM, HIDDEN, NUM_ACTIONS, seed=0)

    # mem_state is None -> (h0, c0) is used inside the kernel.
    dist, value, h_t, c_t = jax.block_until_ready(
        a2c_lstm_forward(x, params, NUM_ACTIONS))

    # correctness check against a pure-JAX reference
    r_dist, r_val, r_h, r_c = ref_forward(x, params)
    # dist uses the approx EUP reciprocal in the softmax -> slightly looser tol.
    np.testing.assert_allclose(np.asarray(dist), np.asarray(r_dist), rtol=2e-3, atol=2e-3)
    np.testing.assert_allclose(np.asarray(value), np.asarray(r_val), rtol=1e-5, atol=1e-5)
    np.testing.assert_allclose(np.asarray(h_t), np.asarray(r_h), rtol=1e-5, atol=1e-5)
    np.testing.assert_allclose(np.asarray(c_t), np.asarray(r_c), rtol=1e-5, atol=1e-5)

    print("KERNEL_OK")
</pallas_src>

<mosaic_0001>
module attributes {stable_mosaic.version = 11 : i64} {
  func.func @a2c_lstm_kernel(%arg0: memref<8x24xf32, #tpu.memory_space<vmem>>, %arg1: memref<24x128xf32, #tpu.memory_space<vmem>>, %arg2: memref<32x128xf32, #tpu.memory_space<vmem>>, %arg3: memref<1x128xf32, #tpu.memory_space<vmem>>, %arg4: memref<1x32xf32, #tpu.memory_space<vmem>>, %arg5: memref<1x32xf32, #tpu.memory_space<vmem>>, %arg6: memref<32x128xf32, #tpu.memory_space<vmem>>, %arg7: memref<1x128xf32, #tpu.memory_space<vmem>>, %arg8: memref<8x128xf32, #tpu.memory_space<vmem>>, %arg9: memref<1x32xf32, #tpu.memory_space<vmem>>, %arg10: memref<1x32xf32, #tpu.memory_space<vmem>>, %arg11: memref<8x128xf32, #tpu.memory_space<vmem>>, %arg12: memref<8x32xf32, #tpu.memory_space<vmem>>) attributes {dimension_semantics = [], scalar_prefetch = 0 : i64, scratch_operands = 2 : i64, tpu.core_type = #tpu.core_type<tc>} {
    %c0 = arith.constant 0 : index
    %c0_0 = arith.constant 0 : index
    %0 = vector.load %arg2[%c0, %c0_0] : memref<32x128xf32, #tpu.memory_space<vmem>>, vector<32x128xf32>
    %c0_1 = arith.constant 0 : index
    %c0_2 = arith.constant 0 : index
    %1 = vector.load %arg0[%c0_1, %c0_2] : memref<8x24xf32, #tpu.memory_space<vmem>>, vector<8x24xf32>
    %c0_3 = arith.constant 0 : index
    %c0_4 = arith.constant 0 : index
    %2 = vector.load %arg1[%c0_3, %c0_4] : memref<24x128xf32, #tpu.memory_space<vmem>>, vector<24x128xf32>
    %cst = arith.constant dense<0.000000e+00> : vector<8x128xf32>
    %3 = tpu.matmul %1, %2, %cst {dimension_numbers = #tpu.dot_dimension_numbers<[1], [0], [0], [1], [0, 0, 1, 1], [], []>} : vector<8x24xf32>, vector<24x128xf32>, vector<8x128xf32> -> vector<8x128xf32>
    %c0_5 = arith.constant 0 : index
    %c0_6 = arith.constant 0 : index
    %4 = vector.load %arg3[%c0_5, %c0_6] : memref<1x128xf32, #tpu.memory_space<vmem>>, vector<1x128xf32>
    %5 = vector.broadcast %4 : vector<1x128xf32> to vector<8x128xf32>
    %6 = arith.addf %3, %5 : vector<8x128xf32>
    %c0_7 = arith.constant 0 : index
    %c0_8 = arith.constant 0 : index
    %7 = vector.load %arg11[%c0_7, %c0_8] : memref<8x128xf32, #tpu.memory_space<vmem>>, vector<8x128xf32>
    tpu.vector_store %arg11[%c0_7, %c0_8], %6 {strides = array<i32>} : memref<8x128xf32, #tpu.memory_space<vmem>>, vector<8x128xf32>,
    %c0_9 = arith.constant 0 : index
    %c0_10 = arith.constant 0 : index
    %8 = vector.load %arg4[%c0_9, %c0_10] : memref<1x32xf32, #tpu.memory_space<vmem>>, vector<1x32xf32>
    %c0_11 = arith.constant 0 : index
    %c0_12 = arith.constant 0 : index
    %9 = vector.load %arg5[%c0_11, %c0_12] : memref<1x32xf32, #tpu.memory_space<vmem>>, vector<1x32xf32>
    %c0_i32 = arith.constant 0 : i32
    %10 = arith.index_cast %c0_i32 : i32 to index
    %c0_13 = arith.constant 0 : index
    %11 = vector.load %arg11[%10, %c0_13] : memref<8x128xf32, #tpu.memory_space<vmem>>, vector<1x128xf32>
    %cst_14 = arith.constant dense<0.000000e+00> : vector<1x128xf32>
    %12 = tpu.matmul %8, %0, %cst_14 {dimension_numbers = #tpu.dot_dimension_numbers<[1], [0], [0], [1], [0, 0, 1, 1], [], []>} : vector<1x32xf32>, vector<32x128xf32>, vector<1x128xf32> -> vector<1x128xf32>
    %13 = arith.addf %11, %12 : vector<1x128xf32>
    %14 = arith.negf %13 : vector<1x128xf32>
    %15 = math.exp %14 : vector<1x128xf32>
    %cst_15 = arith.constant 1.000000e+00 : f32
    %16 = vector.broadcast %cst_15 : f32 to vector<1x128xf32>
    %17 = arith.addf %16, %15 : vector<1x128xf32>
    %18 = arith.divf %16, %17 : vector<1x128xf32>
    %19 = math.tanh %13 : vector<1x128xf32>
    %20 = vector.extract_strided_slice %18 {offsets = [0, 0], sizes = [1, 32], strides = [1, 1]} : vector<1x128xf32> to vector<1x32xf32>
    %21 = vector.extract_strided_slice %18 {offsets = [0, 32], sizes = [1, 32], strides = [1, 1]} : vector<1x128xf32> to vector<1x32xf32>
    %22 = vector.extract_strided_slice %19 {offsets = [0, 64], sizes = [1, 32], strides = [1, 1]} : vector<1x128xf32> to vector<1x32xf32>
    %23 = vector.extract_strided_slice %18 {offsets = [0, 96], sizes = [1, 32], strides = [1, 1]} : vector<1x128xf32> to vector<1x32xf32>
    %24 = arith.mulf %21, %9 : vector<1x32xf32>
    %25 = arith.mulf %20, %22 : vector<1x32xf32>
    %26 = arith.addf %24, %25 : vector<1x32xf32>
    %27 = math.tanh %26 : vector<1x32xf32>
    %28 = arith.mulf %23, %27 : vector<1x32xf32>
    %29 = arith.index_cast %c0_i32 : i32 to index
    %c0_16 = arith.constant 0 : index
    %30 = vector.load %arg12[%29, %c0_16] : memref<8x32xf32, #tpu.memory_space<vmem>>, vector<1x32xf32>
    tpu.vector_store %arg12[%29, %c0_16], %28 {strides = array<i32>} : memref<8x32xf32, #tpu.memory_space<vmem>>, vector<1x32xf32>,
    %c1_i32 = arith.constant 1 : i32
    %31 = arith.index_cast %c1_i32 : i32 to index
    %c0_17 = arith.constant 0 : index
    %32 = vector.load %arg11[%31, %c0_17] : memref<8x128xf32, #tpu.memory_space<vmem>>, vector<1x128xf32>
    %cst_18 = arith.constant dense<0.000000e+00> : vector<1x128xf32>
    %33 = tpu.matmul %28, %0, %cst_18 {dimension_numbers = #tpu.dot_dimension_numbers<[1], [0], [0], [1], [0, 0, 1, 1], [], []>} : vector<1x32xf32>, vector<32x128xf32>, vector<1x128xf32> -> vector<1x128xf32>
    %34 = arith.addf %32, %33 : vector<1x128xf32>
    %35 = arith.negf %34 : vector<1x128xf32>
    %36 = math.exp %35 : vector<1x128xf32>
    %cst_19 = arith.constant 1.000000e+00 : f32
    %37 = vector.broadcast %cst_19 : f32 to vector<1x128xf32>
    %38 = arith.addf %37, %36 : vector<1x128xf32>
    %39 = arith.divf %37, %38 : vector<1x128xf32>
    %40 = math.tanh %34 : vector<1x128xf32>
    %41 = vector.extract_strided_slice %39 {offsets = [0, 0], sizes = [1, 32], strides = [1, 1]} : vector<1x128xf32> to vector<1x32xf32>
    %42 = vector.extract_strided_slice %39 {offsets = [0, 32], sizes = [1, 32], strides = [1, 1]} : vector<1x128xf32> to vector<1x32xf32>
    %43 = vector.extract_strided_slice %40 {offsets = [0, 64], sizes = [1, 32], strides = [1, 1]} : vector<1x128xf32> to vector<1x32xf32>
    %44 = vector.extract_strided_slice %39 {offsets = [0, 96], sizes = [1, 32], strides = [1, 1]} : vector<1x128xf32> to vector<1x32xf32>
    %45 = arith.mulf %42, %26 : vector<1x32xf32>
    %46 = arith.mulf %41, %43 : vector<1x32xf32>
    %47 = arith.addf %45, %46 : vector<1x32xf32>
    %48 = math.tanh %47 : vector<1x32xf32>
    %49 = arith.mulf %44, %48 : vector<1x32xf32>
    %50 = arith.index_cast %c1_i32 : i32 to index
    %c0_20 = arith.constant 0 : index
    %51 = vector.load %arg12[%50, %c0_20] : memref<8x32xf32, #tpu.memory_space<vmem>>, vector<1x32xf32>
    tpu.vector_store %arg12[%50, %c0_20], %49 {strides = array<i32>} : memref<8x32xf32, #tpu.memory_space<vmem>>, vector<1x32xf32>,
    %c2_i32 = arith.constant 2 : i32
    %52 = arith.index_cast %c2_i32 : i32 to index
    %c0_21 = arith.constant 0 : index
    %53 = vector.load %arg11[%52, %c0_21] : memref<8x128xf32, #tpu.memory_space<vmem>>, vector<1x128xf32>
    %cst_22 = arith.constant dense<0.000000e+00> : vector<1x128xf32>
    %54 = tpu.matmul %49, %0, %cst_22 {dimension_numbers = #tpu.dot_dimension_numbers<[1], [0], [0], [1], [0, 0, 1, 1], [], []>} : vector<1x32xf32>, vector<32x128xf32>, vector<1x128xf32> -> vector<1x128xf32>
    %55 = arith.addf %53, %54 : vector<1x128xf32>
    %56 = arith.negf %55 : vector<1x128xf32>
    %57 = math.exp %56 : vector<1x128xf32>
    %cst_23 = arith.constant 1.000000e+00 : f32
    %58 = vector.broadcast %cst_23 : f32 to vector<1x128xf32>
    %59 = arith.addf %58, %57 : vector<1x128xf32>
    %60 = arith.divf %58, %59 : vector<1x128xf32>
    %61 = math.tanh %55 : vector<1x128xf32>
    %62 = vector.extract_strided_slice %60 {offsets = [0, 0], sizes = [1, 32], strides = [1, 1]} : vector<1x128xf32> to vector<1x32xf32>
    %63 = vector.extract_strided_slice %60 {offsets = [0, 32], sizes = [1, 32], strides = [1, 1]} : vector<1x128xf32> to vector<1x32xf32>
    %64 = vector.extract_strided_slice %61 {offsets = [0, 64], sizes = [1, 32], strides = [1, 1]} : vector<1x128xf32> to vector<1x32xf32>
    %65 = vector.extract_strided_slice %60 {offsets = [0, 96], sizes = [1, 32], strides = [1, 1]} : vector<1x128xf32> to vector<1x32xf32>
    %66 = arith.mulf %63, %47 : vector<1x32xf32>
    %67 = arith.mulf %62, %64 : vector<1x32xf32>
    %68 = arith.addf %66, %67 : vector<1x32xf32>
    %69 = math.tanh %68 : vector<1x32xf32>
    %70 = arith.mulf %65, %69 : vector<1x32xf32>
    %71 = arith.index_cast %c2_i32 : i32 to index
    %c0_24 = arith.constant 0 : index
    %72 = vector.load %arg12[%71, %c0_24] : memref<8x32xf32, #tpu.memory_space<vmem>>, vector<1x32xf32>
    tpu.vector_store %arg12[%71, %c0_24], %70 {strides = array<i32>} : memref<8x32xf32, #tpu.memory_space<vmem>>, vector<1x32xf32>,
    %c3_i32 = arith.constant 3 : i32
    %73 = arith.index_cast %c3_i32 : i32 to index
    %c0_25 = arith.constant 0 : index
    %74 = vector.load %arg11[%73, %c0_25] : memref<8x128xf32, #tpu.memory_space<vmem>>, vector<1x128xf32>
    %cst_26 = arith.constant dense<0.000000e+00> : vector<1x128xf32>
    %75 = tpu.matmul %70, %0, %cst_26 {dimension_numbers = #tpu.dot_dimension_numbers<[1], [0], [0], [1], [0, 0, 1, 1], [], []>} : vector<1x32xf32>, vector<32x128xf32>, vector<1x128xf32> -> vector<1x128xf32>
    %76 = arith.addf %74, %75 : vector<1x128xf32>
    %77 = arith.negf %76 : vector<1x128xf32>
    %78 = math.exp %77 : vector<1x128xf32>
    %cst_27 = arith.constant 1.000000e+00 : f32
    %79 = vector.broadcast %cst_27 : f32 to vector<1x128xf32>
    %80 = arith.addf %79, %78 : vector<1x128xf32>
    %81 = arith.divf %79, %80 : vector<1x128xf32>
    %82 = math.tanh %76 : vector<1x128xf32>
    %83 = vector.extract_strided_slice %81 {offsets = [0, 0], sizes = [1, 32], strides = [1, 1]} : vector<1x128xf32> to vector<1x32xf32>
    %84 = vector.extract_strided_slice %81 {offsets = [0, 32], sizes = [1, 32], strides = [1, 1]} : vector<1x128xf32> to vector<1x32xf32>
    %85 = vector.extract_strided_slice %82 {offsets = [0, 64], sizes = [1, 32], strides = [1, 1]} : vector<1x128xf32> to vector<1x32xf32>
    %86 = vector.extract_strided_slice %81 {offsets = [0, 96], sizes = [1, 32], strides = [1, 1]} : vector<1x128xf32> to vector<1x32xf32>
    %87 = arith.mulf %84, %68 : vector<1x32xf32>
    %88 = arith.mulf %83, %85 : vector<1x32xf32>
    %89 = arith.addf %87, %88 : vector<1x32xf32>
    %90 = math.tanh %89 : vector<1x32xf32>
    %91 = arith.mulf %86, %90 : vector<1x32xf32>
    %92 = arith.index_cast %c3_i32 : i32 to index
    %c0_28 = arith.constant 0 : index
    %93 = vector.load %arg12[%92, %c0_28] : memref<8x32xf32, #tpu.memory_space<vmem>>, vector<1x32xf32>
    tpu.vector_store %arg12[%92, %c0_28], %91 {strides = array<i32>} : memref<8x32xf32, #tpu.memory_space<vmem>>, vector<1x32xf32>,
    %c4_i32 = arith.constant 4 : i32
    %94 = arith.index_cast %c4_i32 : i32 to index
    %c0_29 = arith.constant 0 : index
    %95 = vector.load %arg11[%94, %c0_29] : memref<8x128xf32, #tpu.memory_space<vmem>>, vector<1x128xf32>
    %cst_30 = arith.constant dense<0.000000e+00> : vector<1x128xf32>
    %96 = tpu.matmul %91, %0, %cst_30 {dimension_numbers = #tpu.dot_dimension_numbers<[1], [0], [0], [1], [0, 0, 1, 1], [], []>} : vector<1x32xf32>, vector<32x128xf32>, vector<1x128xf32> -> vector<1x128xf32>
    %97 = arith.addf %95, %96 : vector<1x128xf32>
    %98 = arith.negf %97 : vector<1x128xf32>
    %99 = math.exp %98 : vector<1x128xf32>
    %cst_31 = arith.constant 1.000000e+00 : f32
    %100 = vector.broadcast %cst_31 : f32 to vector<1x128xf32>
    %101 = arith.addf %100, %99 : vector<1x128xf32>
    %102 = arith.divf %100, %101 : vector<1x128xf32>
    %103 = math.tanh %97 : vector<1x128xf32>
    %104 = vector.extract_strided_slice %102 {offsets = [0, 0], sizes = [1, 32], strides = [1, 1]} : vector<1x128xf32> to vector<1x32xf32>
    %105 = vector.extract_strided_slice %102 {offsets = [0, 32], sizes = [1, 32], strides = [1, 1]} : vector<1x128xf32> to vector<1x32xf32>
    %106 = vector.extract_strided_slice %103 {offsets = [0, 64], sizes = [1, 32], strides = [1, 1]} : vector<1x128xf32> to vector<1x32xf32>
    %107 = vector.extract_strided_slice %102 {offsets = [0, 96], sizes = [1, 32], strides = [1, 1]} : vector<1x128xf32> to vector<1x32xf32>
    %108 = arith.mulf %105, %89 : vector<1x32xf32>
    %109 = arith.mulf %104, %106 : vector<1x32xf32>
    %110 = arith.addf %108, %109 : vector<1x32xf32>
    %111 = math.tanh %110 : vector<1x32xf32>
    %112 = arith.mulf %107, %111 : vector<1x32xf32>
    %113 = arith.index_cast %c4_i32 : i32 to index
    %c0_32 = arith.constant 0 : index
    %114 = vector.load %arg12[%113, %c0_32] : memref<8x32xf32, #tpu.memory_space<vmem>>, vector<1x32xf32>
    tpu.vector_store %arg12[%113, %c0_32], %112 {strides = array<i32>} : memref<8x32xf32, #tpu.memory_space<vmem>>, vector<1x32xf32>,
    %c5_i32 = arith.constant 5 : i32
    %115 = arith.index_cast %c5_i32 : i32 to index
    %c0_33 = arith.constant 0 : index
    %116 = vector.load %arg11[%115, %c0_33] : memref<8x128xf32, #tpu.memory_space<vmem>>, vector<1x128xf32>
    %cst_34 = arith.constant dense<0.000000e+00> : vector<1x128xf32>
    %117 = tpu.matmul %112, %0, %cst_34 {dimension_numbers = #tpu.dot_dimension_numbers<[1], [0], [0], [1], [0, 0, 1, 1], [], []>} : vector<1x32xf32>, vector<32x128xf32>, vector<1x128xf32> -> vector<1x128xf32>
    %118 = arith.addf %116, %117 : vector<1x128xf32>
    %119 = arith.negf %118 : vector<1x128xf32>
    %120 = math.exp %119 : vector<1x128xf32>
    %cst_35 = arith.constant 1.000000e+00 : f32
    %121 = vector.broadcast %cst_35 : f32 to vector<1x128xf32>
    %122 = arith.addf %121, %120 : vector<1x128xf32>
    %123 = arith.divf %121, %122 : vector<1x128xf32>
    %124 = math.tanh %118 : vector<1x128xf32>
    %125 = vector.extract_strided_slice %123 {offsets = [0, 0], sizes = [1, 32], strides = [1, 1]} : vector<1x128xf32> to vector<1x32xf32>
    %126 = vector.extract_strided_slice %123 {offsets = [0, 32], sizes = [1, 32], strides = [1, 1]} : vector<1x128xf32> to vector<1x32xf32>
    %127 = vector.extract_strided_slice %124 {offsets = [0, 64], sizes = [1, 32], strides = [1, 1]} : vector<1x128xf32> to vector<1x32xf32>
    %128 = vector.extract_strided_slice %123 {offsets = [0, 96], sizes = [1, 32], strides = [1, 1]} : vector<1x128xf32> to vector<1x32xf32>
    %129 = arith.mulf %126, %110 : vector<1x32xf32>
    %130 = arith.mulf %125, %127 : vector<1x32xf32>
    %131 = arith.addf %129, %130 : vector<1x32xf32>
    %132 = math.tanh %131 : vector<1x32xf32>
    %133 = arith.mulf %128, %132 : vector<1x32xf32>
    %134 = arith.index_cast %c5_i32 : i32 to index
    %c0_36 = arith.constant 0 : index
    %135 = vector.load %arg12[%134, %c0_36] : memref<8x32xf32, #tpu.memory_space<vmem>>, vector<1x32xf32>
    tpu.vector_store %arg12[%134, %c0_36], %133 {strides = array<i32>} : memref<8x32xf32, #tpu.memory_space<vmem>>, vector<1x32xf32>,
    %c6_i32 = arith.constant 6 : i32
    %136 = arith.index_cast %c6_i32 : i32 to index
    %c0_37 = arith.constant 0 : index
    %137 = vector.load %arg11[%136, %c0_37] : memref<8x128xf32, #tpu.memory_space<vmem>>, vector<1x128xf32>
    %cst_38 = arith.constant dense<0.000000e+00> : vector<1x128xf32>
    %138 = tpu.matmul %133, %0, %cst_38 {dimension_numbers = #tpu.dot_dimension_numbers<[1], [0], [0], [1], [0, 0, 1, 1], [], []>} : vector<1x32xf32>, vector<32x128xf32>, vector<1x128xf32> -> vector<1x128xf32>
    %139 = arith.addf %137, %138 : vector<1x128xf32>
    %140 = arith.negf %139 : vector<1x128xf32>
    %141 = math.exp %140 : vector<1x128xf32>
    %cst_39 = arith.constant 1.000000e+00 : f32
    %142 = vector.broadcast %cst_39 : f32 to vector<1x128xf32>
    %143 = arith.addf %142, %141 : vector<1x128xf32>
    %144 = arith.divf %142, %143 : vector<1x128xf32>
    %145 = math.tanh %139 : vector<1x128xf32>
    %146 = vector.extract_strided_slice %144 {offsets = [0, 0], sizes = [1, 32], strides = [1, 1]} : vector<1x128xf32> to vector<1x32xf32>
    %147 = vector.extract_strided_slice %144 {offsets = [0, 32], sizes = [1, 32], strides = [1, 1]} : vector<1x128xf32> to vector<1x32xf32>
    %148 = vector.extract_strided_slice %145 {offsets = [0, 64], sizes = [1, 32], strides = [1, 1]} : vector<1x128xf32> to vector<1x32xf32>
    %149 = vector.extract_strided_slice %144 {offsets = [0, 96], sizes = [1, 32], strides = [1, 1]} : vector<1x128xf32> to vector<1x32xf32>
    %150 = arith.mulf %147, %131 : vector<1x32xf32>
    %151 = arith.mulf %146, %148 : vector<1x32xf32>
    %152 = arith.addf %150, %151 : vector<1x32xf32>
    %153 = math.tanh %152 : vector<1x32xf32>
    %154 = arith.mulf %149, %153 : vector<1x32xf32>
    %155 = arith.index_cast %c6_i32 : i32 to index
    %c0_40 = arith.constant 0 : index
    %156 = vector.load %arg12[%155, %c0_40] : memref<8x32xf32, #tpu.memory_space<vmem>>, vector<1x32xf32>
    tpu.vector_store %arg12[%155, %c0_40], %154 {strides = array<i32>} : memref<8x32xf32, #tpu.memory_space<vmem>>, vector<1x32xf32>,
    %c7_i32 = arith.constant 7 : i32
    %157 = arith.index_cast %c7_i32 : i32 to index
    %c0_41 = arith.constant 0 : index
    %158 = vector.load %arg11[%157, %c0_41] : memref<8x128xf32, #tpu.memory_space<vmem>>, vector<1x128xf32>
    %cst_42 = arith.constant dense<0.000000e+00> : vector<1x128xf32>
    %159 = tpu.matmul %154, %0, %cst_42 {dimension_numbers = #tpu.dot_dimension_numbers<[1], [0], [0], [1], [0, 0, 1, 1], [], []>} : vector<1x32xf32>, vector<32x128xf32>, vector<1x128xf32> -> vector<1x128xf32>
    %160 = arith.addf %158, %159 : vector<1x128xf32>
    %161 = arith.negf %160 : vector<1x128xf32>
    %162 = math.exp %161 : vector<1x128xf32>
    %cst_43 = arith.constant 1.000000e+00 : f32
    %163 = vector.broadcast %cst_43 : f32 to vector<1x128xf32>
    %164 = arith.addf %163, %162 : vector<1x128xf32>
    %165 = arith.divf %163, %164 : vector<1x128xf32>
    %166 = math.tanh %160 : vector<1x128xf32>
    %167 = vector.extract_strided_slice %165 {offsets = [0, 0], sizes = [1, 32], strides = [1, 1]} : vector<1x128xf32> to vector<1x32xf32>
    %168 = vector.extract_strided_slice %165 {offsets = [0, 32], sizes = [1, 32], strides = [1, 1]} : vector<1x128xf32> to vector<1x32xf32>
    %169 = vector.extract_strided_slice %166 {offsets = [0, 64], sizes = [1, 32], strides = [1, 1]} : vector<1x128xf32> to vector<1x32xf32>
    %170 = vector.extract_strided_slice %165 {offsets = [0, 96], sizes = [1, 32], strides = [1, 1]} : vector<1x128xf32> to vector<1x32xf32>
    %171 = arith.mulf %168, %152 : vector<1x32xf32>
    %172 = arith.mulf %167, %169 : vector<1x32xf32>
    %173 = arith.addf %171, %172 : vector<1x32xf32>
    %174 = math.tanh %173 : vector<1x32xf32>
    %175 = arith.mulf %170, %174 : vector<1x32xf32>
    %176 = arith.index_cast %c7_i32 : i32 to index
    %c0_44 = arith.constant 0 : index
    %177 = vector.load %arg12[%176, %c0_44] : memref<8x32xf32, #tpu.memory_space<vmem>>, vector<1x32xf32>
    tpu.vector_store %arg12[%176, %c0_44], %175 {strides = array<i32>} : memref<8x32xf32, #tpu.memory_space<vmem>>, vector<1x32xf32>,
    %c8_i32 = arith.constant 8 : i32
    %c0_45 = arith.constant 0 : index
    %c0_46 = arith.constant 0 : index
    %178 = vector.load %arg9[%c0_45, %c0_46] : memref<1x32xf32, #tpu.memory_space<vmem>>, vector<1x32xf32>
    tpu.vector_store %arg9[%c0_45, %c0_46], %175 {strides = array<i32>} : memref<1x32xf32, #tpu.memory_space<vmem>>, vector<1x32xf32>,
    %c0_47 = arith.constant 0 : index
    %c0_48 = arith.constant 0 : index
    %179 = vector.load %arg10[%c0_47, %c0_48] : memref<1x32xf32, #tpu.memory_space<vmem>>, vector<1x32xf32>
    tpu.vector_store %arg10[%c0_47, %c0_48], %173 {strides = array<i32>} : memref<1x32xf32, #tpu.memory_space<vmem>>, vector<1x32xf32>,
    %c0_49 = arith.constant 0 : index
    %c0_50 = arith.constant 0 : index
    %180 = vector.load %arg12[%c0_49, %c0_50] : memref<8x32xf32, #tpu.memory_space<vmem>>, vector<8x32xf32>
    %c0_51 = arith.constant 0 : index
    %c0_52 = arith.constant 0 : index
    %181 = vector.load %arg6[%c0_51, %c0_52] : memref<32x128xf32, #tpu.memory_space<vmem>>, vector<32x128xf32>
    %cst_53 = arith.constant dense<0.000000e+00> : vector<8x128xf32>
    %182 = tpu.matmul %180, %181, %cst_53 {dimension_numbers = #tpu.dot_dimension_numbers<[1], [0], [0], [1], [0, 0, 1, 1], [], []>} : vector<8x32xf32>, vector<32x128xf32>, vector<8x128xf32> -> vector<8x128xf32>
    %c0_54 = arith.constant 0 : index
    %c0_55 = arith.constant 0 : index
    %183 = vector.load %arg7[%c0_54, %c0_55] : memref<1x128xf32, #tpu.memory_space<vmem>>, vector<1x128xf32>
    %184 = vector.broadcast %183 : vector<1x128xf32> to vector<8x128xf32>
    %185 = arith.addf %182, %184 : vector<8x128xf32>
    %186 = tpu.iota {dimensions = array<i32: 1>} : vector<8x128xi32>
    %c4_i32_56 = arith.constant 4 : i32
    %187 = vector.broadcast %c4_i32_56 : i32 to vector<8x128xi32>
    %188 = arith.cmpi slt, %186, %187 : vector<8x128xi32>
    %cst_57 = arith.constant -1.000000e+30 : f32
    %189 = vector.broadcast %cst_57 : f32 to vector<8x128xf32>
    %190 = arith.select %188, %185, %189 : vector<8x128xi1>, vector<8x128xf32>
    %cst_58 = arith.constant dense<0xFF800000> : vector<8xf32>
    %191 = vector.multi_reduction <maximumf>, %190, %cst_58 [1] : vector<8x128xf32> to vector<8xf32>
    %192 = vector.shape_cast %191 : vector<8xf32> to vector<8x1xf32>
    %193 = vector.broadcast %192 : vector<8x1xf32> to vector<8x128xf32>
    %194 = arith.subf %190, %193 : vector<8x128xf32>
    %195 = math.exp %194 : vector<8x128xf32>
    %cst_59 = arith.constant dense<0.000000e+00> : vector<8xf32>
    %196 = vector.multi_reduction <add>, %195, %cst_59 [1] : vector<8x128xf32> to vector<8xf32>
    %197 = vector.shape_cast %196 : vector<8xf32> to vector<8x1xf32>
    %198 = tpu.reciprocal %197 {approx = true} : vector<8x1xf32> -> vector<8x1xf32>
    %199 = vector.broadcast %198 : vector<8x1xf32> to vector<8x128xf32>
    %200 = arith.mulf %195, %199 : vector<8x128xf32>
    %c4_i32_60 = arith.constant 4 : i32
    %201 = vector.broadcast %c4_i32_60 : i32 to vector<8x128xi32>
    %202 = arith.cmpi eq, %186, %201 : vector<8x128xi32>
    %cst_61 = arith.constant 0.000000e+00 : f32
    %203 = vector.broadcast %cst_61 : f32 to vector<8x128xf32>
    %204 = arith.select %202, %185, %203 : vector<8x128xi1>, vector<8x128xf32>
    %205 = arith.addf %200, %204 : vector<8x128xf32>
    %c0_62 = arith.constant 0 : index
    %c0_63 = arith.constant 0 : index
    %206 = vector.load %arg8[%c0_62, %c0_63] : memref<8x128xf32, #tpu.memory_space<vmem>>, vector<8x128xf32>
    tpu.vector_store %arg8[%c0_62, %c0_63], %205 {strides = array<i32>} : memref<8x128xf32, #tpu.memory_space<vmem>>, vector<8x128xf32>,
    return
  }
}

</mosaic_0001>

<bundles_post_ra>
// kernel: tpu_custom_call.1
= control target key start
LH: loop header
LB: loop body
LE: loop exit
PB: predicated region body
PF: predicated region fallthrough
CT: control target
= control target key end

     0   :  { %16 = vsyncpa [#allocation5], 0  ;;  %s1838_s0 = inlined_call_operand.hbm [shape: f32[8,24], index: 0, kind: input, shape index: {}]   ;;  %s1839_s1 = inlined_call_operand.hbm [shape: f32[24,128], index: 1, kind: input, shape index: {}]   ;;  %s1840_s2 = inlined_call_operand.hbm [shape: f32[32,128], index: 2, kind: input, shape index: {}]   ;;  %s1841_s3 = inlined_call_operand.vmem [shape: f32[1,128], index: 3, kind: input, shape index: {}]   ;;  %s1842_s4 = inlined_call_operand.vmem [shape: f32[1,32], index: 4, kind: input, shape index: {}]   ;;  %s1843_s5 = inlined_call_operand.vmem [shape: f32[1,32], index: 5, kind: input, shape index: {}]   ;;  %s1844_s6 = inlined_call_operand.hbm [shape: f32[32,128], index: 6, kind: input, shape index: {}]   ;;  %s1845_s7 = inlined_call_operand.vmem [shape: f32[1,128], index: 7, kind: input, shape index: {}]   ;;  %s1846_s8 = inlined_call_operand.hbm [shape: f32[8,128], index: 8, kind: output, shape index: {0}]   ;;  %s1847_s9 = inlined_call_operand.hbm [shape: f32[1,32], index: 9, kind: output, shape index: {1}]   ;;  %s1848_s10 = inlined_call_operand.hbm [shape: f32[1,32], index: 10, kind: output, shape index: {2}]  }
   0x1   :  { %17 = vsyncpa [#allocation8], 0 }
   0x2   :  { %18 = vsyncpa [#allocation11], 0 }
   0x3   :  { %19 = vsyncpa [#allocation6], 0 }
   0x4   :  { %20 = vsyncpa [#allocation14], 0  ;;  %s1576_s13 = smov [#allocation7]  }
   0x5   :  { %s36_s14 = sshll.u32 %s1576_s13, 4  ;;  %s37_s14 = int_to_ptr.vmem [resolvable:$true] %s36_s14 }
   0x6   :  { %s1434_s15 = scalar_lea.vmem %s37_s14, 384  ;;  %p1439_p1 = scmp.lt.s32.totalorder %s37_s14, %s37_s14 }
   0x7   :  { %p1435_p0 = scmp.ne.s32.totalorder %s37_s14, %s1434_s15  ;;  %p1440_p2 = scmp.lt.s32.totalorder %s1434_s15, %s1434_s15 }
   0x9   :  { %p1441_p3 = por %p1440_p2, %p1439_p1 }
   0xb   :  { %p1442_p4 = pnand %p1441_p3, %p1435_p0 }
   0xd   :  { %1445 = shalt.err (!%p1442_p4)
}
   0xe   :  { %s1577_s16 = smov 128   ;;  %s1578_s17 = smov 8  }
   0xf   :  { %42 = dma.hbm_to_vmem [thread:$0]  %s1839_s1, 384, %s37_s14, [#allocation8], %s1577_s16, %s1577_s16, %s1578_s17  }
  0x10   :  { %s1579_s20 = smov [#allocation4]   ;;  %s1580_s22 = smov [#allocation9]  }
  0x11   :  { %s27_s21 = sshll.u32 %s1579_s20, 4  ;;  %s48_s23 = sshll.u32 %s1580_s22, 4  ;;  %s28_s21 = int_to_ptr.vmem [resolvable:$true] %s27_s21  ;;  %s49_s23 = int_to_ptr.vmem [resolvable:$true] %s48_s23 }
  0x12   :  { %s1454_s24 = scalar_lea.vmem %s28_s21, 128  ;;  %p1459_p6 = scmp.lt.s32.totalorder %s28_s21, %s28_s21 }
  0x13   :  { %p1455_p5 = scmp.ne.s32.totalorder %s28_s21, %s1454_s24  ;;  %p1460_p7 = scmp.lt.s32.totalorder %s1454_s24, %s1454_s24 }
  0x15   :  { %p1461_p8 = por %p1460_p7, %p1459_p6 }
  0x17   :  { %p1462_p9 = pnand %p1461_p8, %p1455_p5 }
  0x19   :  { %1465 = shalt.err (!%p1462_p9)
}
  0x1a   :  { %30 = dma.hbm_to_vmem [thread:$0]  %s1838_s0, 128, %s28_s21, [#allocation5]  }
  0x1b   :  { %s1474_s27 = scalar_lea.vmem %s49_s23, 512  ;;  %p1479_p11 = scmp.lt.s32.totalorder %s49_s23, %s49_s23 }
  0x1c   :  { %p1475_p10 = scmp.ne.s32.totalorder %s49_s23, %s1474_s27  ;;  %p1480_p12 = scmp.lt.s32.totalorder %s1474_s27, %s1474_s27 }
  0x1e   :  { %p1481_p13 = por %p1480_p12, %p1479_p11 }
  0x20   :  { %p1482_p0 = pnand %p1481_p13, %p1475_p10 }
  0x22   :  { %1485 = shalt.err (!%p1482_p0)
}
  0x23   :  { %54 = dma.hbm_to_vmem [thread:$0]  %s1840_s2, 512, %s49_s23, [#allocation8], %s1577_s16, %s1577_s16, %s1578_s17  }
  0x24   :  { %s1581_s29 = smov [#allocation10]  }
  0x25   :  { %s66_s30 = sshll.u32 %s1581_s29, 4  ;;  %s67_s30 = int_to_ptr.vmem [resolvable:$true] %s66_s30 }
  0x26   :  { %s1494_s11 = scalar_lea.vmem %s67_s30, 512  ;;  %p1499_p2 = scmp.lt.s32.totalorder %s67_s30, %s67_s30 }
  0x27   :  { %p1495_p1 = scmp.ne.s32.totalorder %s67_s30, %s1494_s11  ;;  %p1500_p3 = scmp.lt.s32.totalorder %s1494_s11, %s1494_s11 }
  0x29   :  { %p1501_p4 = por %p1500_p3, %p1499_p2 }
  0x2b   :  { %p1502_p5 = pnand %p1501_p4, %p1495_p1 }
  0x2d   :  { %1505 = shalt.err (!%p1502_p5)
}
  0x2e   :  { %72 = dma.hbm_to_vmem [thread:$0]  %s1844_s6, 512, %s67_s30, [#allocation11], %s1577_s16, %s1577_s16, %s1578_s17  }
  0x2f   :  { %1566 = dma.done.wait [#allocation5], 128  }
  0x30   :  { %1567 = vsyncadd [#allocation5], 4294967168 }
  0x31   :  { %1568 = dma.done.wait [#allocation8], 896  }
  0x32   :  { %1569 = vsyncadd [#allocation8], 4294966400 }
  0x33   :  { %1570 = dma.done.wait [#allocation11], 512  }
  0x34   :  { %1571 = vsyncadd [#allocation11], 4294966784  ;;  %v1582_v0 = vmov 0.0   ;;  %vm1583_vm0 = vmmov 0   ;;  %v94_v1 = vld [vmem:[#allocation7 + $0x10] sm:$0xff]  ;;  %v93_v2 = vld [vmem:[#allocation7 + $0x8] sm:$0xff] }
  0x35   :  { %1236 = vmatprep.subr.mxu0 %v1582_v0  ;;  %1242 = vmatprep.mubr.msk.f32.mxu0 %vm1583_vm0, %v1582_v0  ;;  %v1672_v3 = vld [vmem:[#allocation9 + $0x18] sm:$0xff]  ;;  %v1674_v4 = vld [vmem:[#allocation9 + $0x10] sm:$0xff]  ;;  %v92_v5 = vld [vmem:[#allocation7] sm:$0xff]  ;;  %vm102_vm1 = vcmask 195584   ;;  %vm180_vm2 = vcmask 261120   ;;  %s1584_s14 = smov 64  }
  0x36   :  { %1245 = vmatprep.subr.mxu1 %v1582_v0  ;;  %1253 = vmatprep.mubr.msk.f32.mxu1 %vm1583_vm0, %v1582_v0  ;;  %v91_v6 = vld [vmem:[#allocation4] sm:$0xff]  ;;  %v1679_v7 = vld [vmem:[#allocation9 + $0x8] sm:$0xff]  ;;  %v177_v9 = vld [vmem:[%s1842_s4] sm:$0x1]  ;;  %s1585_s17 = smov 32   ;;  %vm291_vm3 = vcmask 253952  }
  0x37   :  { %1237 = vmatpush3.msra.mxu0 %v94_v1  ;;  %1246 = vmatpush3.msra.mxu1 %v1672_v3  ;;  %v1684_v8 = vld [vmem:[#allocation9] sm:$0xff]  ;;  %v1166_v10 = vld [vmem:[%s1841_s3] ss:$0 sm:$0xff]  ;;  %s1586_s18 = smov [#allocation13]  }
  0x38   :  { %1238 = vmatprep.subr.mxu0 %v1582_v0  ;;  %1247 = vmatprep.subr.mxu1 %v1582_v0  ;;  %v1170_v19 = vld [vmem:[%s1843_s5] ss:$0 sm:$0xff]  ;;  %s1138_s19 = sshll.u32 %s1586_s18, 4  ;;  %s1139_s19 = int_to_ptr.vmem [resolvable:$true] %s1138_s19 }
  0x39   :  { %1239 = vmatpush3.msra.mxu0 %v93_v2  ;;  %1248 = vmatpush3.msra.mxu1 %v1674_v4  ;;  %s1506_s20 = scalar_lea.vmem %s1139_s19, 16  ;;  %p1511_p7 = scmp.lt.s32.totalorder %s1139_s19, %s1139_s19 }
  0x3a   :  { %1240 = vmatprep.subr.mxu0 %v1582_v0  ;;  %1249 = vmatprep.subr.mxu1 %v1582_v0  ;;  %p1507_p6 = scmp.ne.s32.totalorder %s1139_s19, %s1506_s20 }
  0x3b   :  { %1241 = vmatpush3.msra.mxu0 %v92_v5  ;;  %1250 = vmatpush3.msra.mxu1 %v1679_v7 }
  0x3c   :  { %1243 = vmatmul.mubr.msk.f32.vlgmr.msra.gmra.mxu0 %vm102_vm1, %v91_v6  ;;  %1251 = vmatprep.subr.mxu1 %v1582_v0 }
  0x3d   :  { %1256 = vmatprep.subr.mxu0 %v1582_v0  ;;  %1252 = vmatpush3.msra.mxu1 %v1684_v8 }
  0x3e   :  { %1257 = vmatpush3.msra.mxu0 %v1672_v3  ;;  %1254 = vmatmul.mubr.msk.f32.vlgmr.msra.gmra.mxu1 %vm180_vm2, %v177_v9 }
  0x3f   :  { %1258 = vmatprep.subr.mxu0 %v1582_v0  ;;  %1264 = vmatprep.mubr.msk.f32.mxu0 %vm1583_vm0, %v1582_v0 }
  0x40   :  { %1259 = vmatpush3.msra.mxu0 %v1674_v4  ;;  %1267 = vmatprep.subr.mxu1 %v1582_v0 }
  0x41   :  { %1260 = vmatprep.subr.mxu0 %v1582_v0  ;;  %1268 = vmatpush3.msra.mxu1 %v1672_v3 }
  0x42   :  { %1261 = vmatpush3.msra.mxu0 %v1679_v7  ;;  %1269 = vmatprep.subr.mxu1 %v1582_v0 }
  0x43   :  { %1262 = vmatprep.subr.mxu0 %v1582_v0  ;;  %1270 = vmatpush3.msra.mxu1 %v1674_v4 }
  0x44   :  { %1263 = vmatpush3.msra.mxu0 %v1684_v8  ;;  %1271 = vmatprep.subr.mxu1 %v1582_v0 }
  0x45   :  { %1275 = vmatprep.mubr.msk.f32.mxu1 %vm1583_vm0, %v1582_v0  ;;  %1272 = vmatpush3.msra.mxu1 %v1679_v7 }
  0x46   :  { %1278 = vmatprep.subr.mxu0 %v1582_v0  ;;  %1273 = vmatprep.subr.mxu1 %v1582_v0 }
  0x47   :  { %1274 = vmatpush3.msra.mxu1 %v1684_v8 }
  0x48   :  { %1289 = vmatprep.subr.mxu1 %v1582_v0 }
  0xfc   :  { %v172_v11 = vpop.f32.mrf.mxu0 }
  0xfd   :  { %v173_v12 = vadd.f32 %v1166_v10, %v172_v11 }
  0xfe   :  { %v1244_v13 = vpop.f32.mrf.mxu0  ;;  %v250_v14 = vpop.f32.mrf.mxu1 }
  0xff   :  { %176 = vst [vmem:[#allocation2] sm:$0xff] %v173_v12 }
 0x100   :  { %v1255_v15 = vpop.f32.mrf.mxu1 }
 0x106   :  { %v179_v16 = vld [vmem:[#allocation2] sm:$0x1]  ;;  %v293_v34 = vld [vmem:[#allocation2 + $0x1] sm:$0x1]  ;;  %v396_v52 = vld [vmem:[#allocation2 + $0x2] sm:$0x1] }
 0x107   :  { %v254_v17 = vadd.f32 %v250_v14, %v179_v16  ;;  %v499_v11 = vld [vmem:[#allocation2 + $0x3] sm:$0x1] }
 0x109   :  { %1358 = vtanh.f32 %v254_v17  ;;  %v1169_v20 = vmul.f32 -1.442695, %v254_v17 }
 0x10b   :  { %1360 = vpow2.f32 %v1169_v20 }
 0x116   :  { %v1359_v18 = vpop.eup %1358 }
 0x117   :  { %272 = vrot.lane.b32.xlu0 %v1359_v18, %s1584_s14 }
 0x118   :  { %v1361_v21 = vpop.eup %1360 }
 0x119   :  { %v258_v22 = vadd.f32 1.0, %v1361_v21 }
 0x11b   :  { %267 = vrot.lane.b32.xlu0 %v1170_v19, %s1585_s17  ;;  %1362 = vrcp.f32 %v258_v22 }
 0x128   :  { %v1363_v23 = vpop.eup %1362 }
 0x189   :  { %v273_v24 = vpop.permute.xlu0 %272 }
 0x18a   :  { %v275_v25 = vmul.f32 %v1363_v23, %v273_v24 }
 0x18c   :  { %277 = vrot.lane.b32.xlu1 %v275_v25, %s1585_s17 }
 0x18d   :  { %v268_v26 = vpop.permute.xlu0 %267 }
 0x18e   :  { %v270_v27 = vmul.f32 %v1363_v23, %v268_v26 }
 0x1fe   :  { %v278_v28 = vpop.permute.xlu1 %277 }
 0x1ff   :  { %v280_v29 = vadd.f32 %v278_v28, %v270_v27 }
 0x201   :  { %1364 = vtanh.f32 %v280_v29 }
 0x20e   :  { %v1365_v30 = vpop.eup %1364 }
 0x20f   :  { %283 = vrot.lane.b32.xlu1 %v1365_v30, %s1584_s14 }
 0x281   :  { %v284_v31 = vpop.permute.xlu1 %283 }
 0x282   :  { %v286_v32 = vmul.f32 %v1363_v23, %v284_v31 }
 0x284   :  { %288 = vrot.lane.b32.xlu0 %v286_v32, %s1585_s17 }
 0x2f6   :  { %v289_v33 = vpop.permute.xlu0 %288 }
 0x2f7   :  { %292 = vst.msk [vmem:[#allocation3] sm:$0x1] %vm291_vm3, %v289_v33  ;;  %1265 = vmatmul.mubr.msk.f32.vlgmr.msra.gmra.mxu0 %vm180_vm2, %v289_v33 }
 0x2f8   :  { %1279 = vmatpush3.msra.mxu0 %v1672_v3  ;;  %1286 = vmatprep.mubr.msk.f32.mxu0 %vm1583_vm0, %v1582_v0 }
 0x2f9   :  { %1280 = vmatprep.subr.mxu0 %v1582_v0 }
 0x2fa   :  { %1281 = vmatpush3.msra.mxu0 %v1674_v4 }
 0x2fb   :  { %1282 = vmatprep.subr.mxu0 %v1582_v0 }
 0x2fc   :  { %1283 = vmatpush3.msra.mxu0 %v1679_v7 }
 0x2fd   :  { %1284 = vmatprep.subr.mxu0 %v1582_v0 }
 0x2fe   :  { %1285 = vmatpush3.msra.mxu0 %v1684_v8 }
 0x2ff   :  { %1300 = vmatprep.subr.mxu0 %v1582_v0 }
 0x3b7   :  { %v362_v35 = vpop.f32.mrf.mxu0 }
 0x3b8   :  { %v366_v36 = vadd.f32 %v362_v35, %v293_v34 }
 0x3b9   :  { %v1266_v37 = vpop.f32.mrf.mxu0 }
 0x3ba   :  { %1366 = vtanh.f32 %v366_v36  ;;  %v1172_v39 = vmul.f32 -1.442695, %v366_v36 }
 0x3bc   :  { %1368 = vpow2.f32 %v1172_v39 }
 0x3c7   :  { %v1367_v38 = vpop.eup %1366 }
 0x3c8   :  { %376 = vrot.lane.b32.xlu1 %v1367_v38, %s1584_s14 }
 0x3c9   :  { %v1369_v40 = vpop.eup %1368 }
 0x3ca   :  { %v370_v41 = vadd.f32 1.0, %v1369_v40 }
 0x3cc   :  { %1370 = vrcp.f32 %v370_v41 }
 0x3d9   :  { %v1371_v42 = vpop.eup %1370 }
 0x3da   :  { %v374_v45 = vmul.f32 %v1371_v42, %v280_v29  ;;  %v602_v29 = vld [vmem:[#allocation2 + $0x4] sm:$0x1] }
 0x43a   :  { %v377_v43 = vpop.permute.xlu1 %376 }
 0x43b   :  { %v379_v44 = vmul.f32 %v1371_v42, %v377_v43 }
 0x43d   :  { %381 = vrot.lane.b32.xlu0 %v379_v44, %s1585_s17 }
 0x4af   :  { %v382_v46 = vpop.permute.xlu0 %381 }
 0x4b0   :  { %v384_v47 = vadd.f32 %v382_v46, %v374_v45 }
 0x4b2   :  { %1372 = vtanh.f32 %v384_v47 }
 0x4bf   :  { %v1373_v48 = vpop.eup %1372 }
 0x4c0   :  { %387 = vrot.lane.b32.xlu1 %v1373_v48, %s1584_s14 }
 0x532   :  { %v388_v49 = vpop.permute.xlu1 %387 }
 0x533   :  { %v390_v50 = vmul.f32 %v1371_v42, %v388_v49 }
 0x535   :  { %392 = vrot.lane.b32.xlu0 %v390_v50, %s1585_s17 }
 0x5a7   :  { %v393_v51 = vpop.permute.xlu0 %392 }
 0x5a8   :  { %395 = vst.msk [vmem:[#allocation3 + $0x1] sm:$0x1] %vm291_vm3, %v393_v51  ;;  %1276 = vmatmul.mubr.msk.f32.vlgmr.msra.gmra.mxu1 %vm180_vm2, %v393_v51 }
 0x5a9   :  { %1290 = vmatpush3.msra.mxu1 %v1672_v3  ;;  %1297 = vmatprep.mubr.msk.f32.mxu1 %vm1583_vm0, %v1582_v0 }
 0x5aa   :  { %1291 = vmatprep.subr.mxu1 %v1582_v0 }
 0x5ab   :  { %1292 = vmatpush3.msra.mxu1 %v1674_v4 }
 0x5ac   :  { %1293 = vmatprep.subr.mxu1 %v1582_v0 }
 0x5ad   :  { %1294 = vmatpush3.msra.mxu1 %v1679_v7 }
 0x5ae   :  { %1295 = vmatprep.subr.mxu1 %v1582_v0 }
 0x5af   :  { %1296 = vmatpush3.msra.mxu1 %v1684_v8 }
 0x5b0   :  { %1311 = vmatprep.subr.mxu1 %v1582_v0 }
 0x668   :  { %v465_v53 = vpop.f32.mrf.mxu1 }
 0x669   :  { %v469_v54 = vadd.f32 %v465_v53, %v396_v52 }
 0x66a   :  { %v1277_v55 = vpop.f32.mrf.mxu1 }
 0x66b   :  { %1374 = vtanh.f32 %v469_v54  ;;  %v1174_v57 = vmul.f32 -1.442695, %v469_v54 }
 0x66d   :  { %1376 = vpow2.f32 %v1174_v57 }
 0x678   :  { %v1375_v56 = vpop.eup %1374 }
 0x679   :  { %479 = vrot.lane.b32.xlu1 %v1375_v56, %s1584_s14 }
 0x67a   :  { %v1377_v58 = vpop.eup %1376 }
 0x67b   :  { %v473_v59 = vadd.f32 1.0, %v1377_v58 }
 0x67d   :  { %1378 = vrcp.f32 %v473_v59 }
 0x68a   :  { %v1379_v60 = vpop.eup %1378 }
 0x68b   :  { %v477_v63 = vmul.f32 %v1379_v60, %v384_v47  ;;  %v705_v47 = vld [vmem:[#allocation2 + $0x5] sm:$0x1] }
 0x6eb   :  { %v480_v61 = vpop.permute.xlu1 %479 }
 0x6ec   :  { %v482_v62 = vmul.f32 %v1379_v60, %v480_v61  ;;  %v808_v61 = vld [vmem:[#allocation2 + $0x6] sm:$0x1] }
 0x6ee   :  { %484 = vrot.lane.b32.xlu0 %v482_v62, %s1585_s17 }
 0x760   :  { %v485_v1 = vpop.permute.xlu0 %484 }
 0x761   :  { %v487_v2 = vadd.f32 %v485_v1, %v477_v63 }
 0x763   :  { %1380 = vtanh.f32 %v487_v2 }
 0x770   :  { %v1381_v5 = vpop.eup %1380 }
 0x771   :  { %490 = vrot.lane.b32.xlu1 %v1381_v5, %s1584_s14 }
 0x7e3   :  { %v491_v6 = vpop.permute.xlu1 %490 }
 0x7e4   :  { %v493_v9 = vmul.f32 %v1379_v60, %v491_v6 }
 0x7e6   :  { %495 = vrot.lane.b32.xlu0 %v493_v9, %s1585_s17 }
 0x858   :  { %v496_v10 = vpop.permute.xlu0 %495 }
 0x859   :  { %498 = vst.msk [vmem:[#allocation3 + $0x2] sm:$0x1] %vm291_vm3, %v496_v10  ;;  %1287 = vmatmul.mubr.msk.f32.vlgmr.msra.gmra.mxu0 %vm180_vm2, %v496_v10 }
 0x85a   :  { %1301 = vmatpush3.msra.mxu0 %v1672_v3  ;;  %1308 = vmatprep.mubr.msk.f32.mxu0 %vm1583_vm0, %v1582_v0 }
 0x85b   :  { %1302 = vmatprep.subr.mxu0 %v1582_v0 }
 0x85c   :  { %1303 = vmatpush3.msra.mxu0 %v1674_v4 }
 0x85d   :  { %1304 = vmatprep.subr.mxu0 %v1582_v0 }
 0x85e   :  { %1305 = vmatpush3.msra.mxu0 %v1679_v7 }
 0x85f   :  { %1306 = vmatprep.subr.mxu0 %v1582_v0 }
 0x860   :  { %1307 = vmatpush3.msra.mxu0 %v1684_v8 }
 0x861   :  { %1322 = vmatprep.subr.mxu0 %v1582_v0 }
 0x919   :  { %v568_v12 = vpop.f32.mrf.mxu0 }
 0x91a   :  { %v572_v13 = vadd.f32 %v568_v12, %v499_v11 }
 0x91b   :  { %v1288_v14 = vpop.f32.mrf.mxu0 }
 0x91c   :  { %1382 = vtanh.f32 %v572_v13  ;;  %v1176_v16 = vmul.f32 -1.442695, %v572_v13 }
 0x91e   :  { %1384 = vpow2.f32 %v1176_v16 }
 0x929   :  { %v1383_v15 = vpop.eup %1382 }
 0x92a   :  { %582 = vrot.lane.b32.xlu1 %v1383_v15, %s1584_s14 }
 0x92b   :  { %v1385_v17 = vpop.eup %1384 }
 0x92c   :  { %v576_v18 = vadd.f32 1.0, %v1385_v17 }
 0x92e   :  { %1386 = vrcp.f32 %v576_v18 }
 0x93b   :  { %v1387_v19 = vpop.eup %1386 }
 0x93c   :  { %v580_v22 = vmul.f32 %v1387_v19, %v487_v2 }
 0x99c   :  { %v583_v20 = vpop.permute.xlu1 %582 }
 0x99d   :  { %v585_v21 = vmul.f32 %v1387_v19, %v583_v20  ;;  %v911_v20 = vld [vmem:[#allocation2 + $0x7] sm:$0x1] }
 0x99f   :  { %587 = vrot.lane.b32.xlu0 %v585_v21, %s1585_s17 }
 0xa11   :  { %v588_v23 = vpop.permute.xlu0 %587 }
 0xa12   :  { %v590_v24 = vadd.f32 %v588_v23, %v580_v22 }
 0xa14   :  { %1388 = vtanh.f32 %v590_v24 }
 0xa21   :  { %v1389_v25 = vpop.eup %1388 }
 0xa22   :  { %593 = vrot.lane.b32.xlu1 %v1389_v25, %s1584_s14 }
 0xa94   :  { %v594_v26 = vpop.permute.xlu1 %593 }
 0xa95   :  { %v596_v27 = vmul.f32 %v1387_v19, %v594_v26 }
 0xa97   :  { %598 = vrot.lane.b32.xlu0 %v596_v27, %s1585_s17 }
 0xb09   :  { %v599_v28 = vpop.permute.xlu0 %598 }
 0xb0a   :  { %601 = vst.msk [vmem:[#allocation3 + $0x3] sm:$0x1] %vm291_vm3, %v599_v28  ;;  %1298 = vmatmul.mubr.msk.f32.vlgmr.msra.gmra.mxu1 %vm180_vm2, %v599_v28 }
 0xb0b   :  { %1312 = vmatpush3.msra.mxu1 %v1672_v3  ;;  %1319 = vmatprep.mubr.msk.f32.mxu1 %vm1583_vm0, %v1582_v0 }
 0xb0c   :  { %1313 = vmatprep.subr.mxu1 %v1582_v0 }
 0xb0d   :  { %1314 = vmatpush3.msra.mxu1 %v1674_v4 }
 0xb0e   :  { %1315 = vmatprep.subr.mxu1 %v1582_v0 }
 0xb0f   :  { %1316 = vmatpush3.msra.mxu1 %v1679_v7 }
 0xb10   :  { %1317 = vmatprep.subr.mxu1 %v1582_v0 }
 0xb11   :  { %1318 = vmatpush3.msra.mxu1 %v1684_v8 }
 0xb12   :  { %1333 = vmatprep.subr.mxu1 %v1582_v0 }
 0xbca   :  { %v671_v30 = vpop.f32.mrf.mxu1 }
 0xbcb   :  { %v675_v31 = vadd.f32 %v671_v30, %v602_v29 }
 0xbcc   :  { %v1299_v32 = vpop.f32.mrf.mxu1 }
 0xbcd   :  { %1390 = vtanh.f32 %v675_v31  ;;  %v1178_v34 = vmul.f32 -1.442695, %v675_v31 }
 0xbcf   :  { %1392 = vpow2.f32 %v1178_v34 }
 0xbda   :  { %v1391_v33 = vpop.eup %1390 }
 0xbdb   :  { %685 = vrot.lane.b32.xlu1 %v1391_v33, %s1584_s14 }
 0xbdc   :  { %v1393_v35 = vpop.eup %1392 }
 0xbdd   :  { %v679_v36 = vadd.f32 1.0, %v1393_v35  ;;  %v1024_v35 = vld [vmem:[#allocation10 + $0x18] sm:$0xff] }
 0xbdf   :  { %1394 = vrcp.f32 %v679_v36  ;;  %v1023_v36 = vld [vmem:[#allocation10 + $0x10] sm:$0xff] }
 0xbec   :  { %v1395_v37 = vpop.eup %1394 }
 0xbed   :  { %v683_v40 = vmul.f32 %v1395_v37, %v590_v24 }
 0xc4d   :  { %v686_v38 = vpop.permute.xlu1 %685 }
 0xc4e   :  { %v688_v39 = vmul.f32 %v1395_v37, %v686_v38  ;;  %v1021_v38 = vld [vmem:[#allocation10] sm:$0xff] }
 0xc50   :  { %690 = vrot.lane.b32.xlu0 %v688_v39, %s1585_s17 }
 0xcc2   :  { %v691_v41 = vpop.permute.xlu0 %690 }
 0xcc3   :  { %v693_v42 = vadd.f32 %v691_v41, %v683_v40 }
 0xcc5   :  { %1396 = vtanh.f32 %v693_v42 }
 0xcd2   :  { %v1397_v43 = vpop.eup %1396 }
 0xcd3   :  { %696 = vrot.lane.b32.xlu1 %v1397_v43, %s1584_s14  ;;  %v1105_v43 = vlaneseq }
 0xd45   :  { %v697_v44 = vpop.permute.xlu1 %696 }
 0xd46   :  { %v699_v45 = vmul.f32 %v1395_v37, %v697_v44  ;;  %v1022_v37 = vld [vmem:[#allocation10 + $0x8] sm:$0xff]  ;;  %v1106_v44 = vand.u32 127, %v1105_v43 }
 0xd48   :  { %701 = vrot.lane.b32.xlu0 %v699_v45, %s1585_s17  ;;  %v1185_v45 = vld [vmem:[%s1845_s7] ss:$0 sm:$0xff]  ;;  %vm1118_vm4 = vcmp.eq.s32.totalorder %v1106_v44, 4  ;;  %vm1107_vm5 = vcmp.lt.s32.totalorder %v1106_v44, 4  ;;  %s1510_s7 = scalar_lea.vmem %s1139_s19, 32 }
 0xd49   :  { %p1512_p8 = scmp.lt.s32.totalorder %s1510_s7, %s1506_s20 }
 0xd4b   :  { %p1513_p9 = por %p1512_p8, %p1511_p7 }
 0xd4d   :  { %p1514_p10 = pnand %p1513_p9, %p1507_p6 }
 0xdba   :  { %v702_v46 = vpop.permute.xlu0 %701 }
 0xdbb   :  { %704 = vst.msk [vmem:[#allocation3 + $0x4] sm:$0x1] %vm291_vm3, %v702_v46  ;;  %1309 = vmatmul.mubr.msk.f32.vlgmr.msra.gmra.mxu0 %vm180_vm2, %v702_v46 }
 0xdbc   :  { %1323 = vmatpush3.msra.mxu0 %v1672_v3  ;;  %1330 = vmatprep.mubr.msk.f32.mxu0 %vm1583_vm0, %v1582_v0 }
 0xdbd   :  { %1324 = vmatprep.subr.mxu0 %v1582_v0 }
 0xdbe   :  { %1325 = vmatpush3.msra.mxu0 %v1674_v4 }
 0xdbf   :  { %1326 = vmatprep.subr.mxu0 %v1582_v0 }
 0xdc0   :  { %1327 = vmatpush3.msra.mxu0 %v1679_v7 }
 0xdc1   :  { %1328 = vmatprep.subr.mxu0 %v1582_v0 }
 0xdc2   :  { %1329 = vmatpush3.msra.mxu0 %v1684_v8 }
 0xe7b   :  { %v774_v48 = vpop.f32.mrf.mxu0 }
 0xe7c   :  { %v778_v49 = vadd.f32 %v774_v48, %v705_v47 }
 0xe7d   :  { %v1310_v50 = vpop.f32.mrf.mxu0 }
 0xe7e   :  { %1398 = vtanh.f32 %v778_v49  ;;  %v1180_v51 = vmul.f32 -1.442695, %v778_v49 }
 0xe80   :  { %1400 = vpow2.f32 %v1180_v51 }
 0xe8b   :  { %v1399_v3 = vpop.eup %1398 }
 0xe8c   :  { %788 = vrot.lane.b32.xlu1 %v1399_v3, %s1584_s14 }
 0xe8d   :  { %v1401_v52 = vpop.eup %1400 }
 0xe8e   :  { %v782_v4 = vadd.f32 1.0, %v1401_v52 }
 0xe90   :  { %1402 = vrcp.f32 %v782_v4 }
 0xe9d   :  { %v1403_v53 = vpop.eup %1402 }
 0xe9e   :  { %v786_v55 = vmul.f32 %v1403_v53, %v693_v42 }
 0xefe   :  { %v789_v54 = vpop.permute.xlu1 %788 }
 0xeff   :  { %v791_v7 = vmul.f32 %v1403_v53, %v789_v54 }
 0xf01   :  { %793 = vrot.lane.b32.xlu0 %v791_v7, %s1585_s17 }
 0xf73   :  { %v794_v8 = vpop.permute.xlu0 %793 }
 0xf74   :  { %v796_v56 = vadd.f32 %v794_v8, %v786_v55 }
 0xf76   :  { %1404 = vtanh.f32 %v796_v56 }
 0xf83   :  { %v1405_v57 = vpop.eup %1404 }
 0xf84   :  { %799 = vrot.lane.b32.xlu1 %v1405_v57, %s1584_s14 }
 0xff6   :  { %v800_v58 = vpop.permute.xlu1 %799 }
 0xff7   :  { %v802_v59 = vmul.f32 %v1403_v53, %v800_v58 }
 0xff9   :  { %804 = vrot.lane.b32.xlu0 %v802_v59, %s1585_s17 }
0x106b   :  { %v805_v60 = vpop.permute.xlu0 %804 }
0x106c   :  { %807 = vst.msk [vmem:[#allocation3 + $0x5] sm:$0x1] %vm291_vm3, %v805_v60  ;;  %1320 = vmatmul.mubr.msk.f32.vlgmr.msra.gmra.mxu1 %vm180_vm2, %v805_v60 }
0x106d   :  { %1341 = vmatprep.mubr.msk.f32.mxu1 %vm1583_vm0, %v1582_v0  ;;  %1334 = vmatpush3.msra.mxu1 %v1024_v35 }
0x106e   :  { %1335 = vmatprep.subr.mxu1 %v1582_v0 }
0x106f   :  { %1336 = vmatpush3.msra.mxu1 %v1023_v36 }
0x1070   :  { %1337 = vmatprep.subr.mxu1 %v1582_v0 }
0x1071   :  { %1338 = vmatpush3.msra.mxu1 %v1022_v37 }
0x1072   :  { %1339 = vmatprep.subr.mxu1 %v1582_v0 }
0x1073   :  { %1340 = vmatpush3.msra.mxu1 %v1021_v38 }
0x112c   :  { %v877_v62 = vpop.f32.mrf.mxu1 }
0x112d   :  { %v881_v63 = vadd.f32 %v877_v62, %v808_v61 }
0x112e   :  { %v1321_v1 = vpop.f32.mrf.mxu1 }
0x112f   :  { %1406 = vtanh.f32 %v881_v63  ;;  %v1182_v5 = vmul.f32 -1.442695, %v881_v63 }
0x1131   :  { %1408 = vpow2.f32 %v1182_v5 }
0x113c   :  { %v1407_v2 = vpop.eup %1406 }
0x113d   :  { %891 = vrot.lane.b32.xlu1 %v1407_v2, %s1584_s14 }
0x113e   :  { %v1409_v6 = vpop.eup %1408 }
0x113f   :  { %v885_v9 = vadd.f32 1.0, %v1409_v6 }
0x1141   :  { %1410 = vrcp.f32 %v885_v9 }
0x114e   :  { %v1411_v10 = vpop.eup %1410 }
0x114f   :  { %v889_v13 = vmul.f32 %v1411_v10, %v796_v56 }
0x11af   :  { %v892_v11 = vpop.permute.xlu1 %891 }
0x11b0   :  { %v894_v12 = vmul.f32 %v1411_v10, %v892_v11 }
0x11b2   :  { %896 = vrot.lane.b32.xlu0 %v894_v12, %s1585_s17 }
0x1224   :  { %v897_v14 = vpop.permute.xlu0 %896 }
0x1225   :  { %v899_v15 = vadd.f32 %v897_v14, %v889_v13 }
0x1227   :  { %1412 = vtanh.f32 %v899_v15 }
0x1234   :  { %v1413_v16 = vpop.eup %1412 }
0x1235   :  { %902 = vrot.lane.b32.xlu1 %v1413_v16, %s1584_s14 }
0x12a7   :  { %v903_v17 = vpop.permute.xlu1 %902 }
0x12a8   :  { %v905_v18 = vmul.f32 %v1411_v10, %v903_v17 }
0x12aa   :  { %907 = vrot.lane.b32.xlu0 %v905_v18, %s1585_s17 }
0x131c   :  { %v908_v19 = vpop.permute.xlu0 %907 }
0x131d   :  { %910 = vst.msk [vmem:[#allocation3 + $0x6] sm:$0x1] %vm291_vm3, %v908_v19  ;;  %1331 = vmatmul.mubr.msk.f32.vlgmr.msra.gmra.mxu0 %vm180_vm2, %v908_v19 }
0x13dd   :  { %v980_v21 = vpop.f32.mrf.mxu0 }
0x13de   :  { %v984_v22 = vadd.f32 %v980_v21, %v911_v20 }
0x13df   :  { %v1332_v23 = vpop.f32.mrf.mxu0 }
0x13e0   :  { %1414 = vtanh.f32 %v984_v22  ;;  %v1184_v25 = vmul.f32 -1.442695, %v984_v22 }
0x13e2   :  { %1416 = vpow2.f32 %v1184_v25 }
0x13ed   :  { %v1415_v24 = vpop.eup %1414 }
0x13ee   :  { %994 = vrot.lane.b32.xlu1 %v1415_v24, %s1584_s14 }
0x13ef   :  { %v1417_v26 = vpop.eup %1416 }
0x13f0   :  { %v988_v27 = vadd.f32 1.0, %v1417_v26 }
0x13f2   :  { %1418 = vrcp.f32 %v988_v27 }
0x13ff   :  { %v1419_v28 = vpop.eup %1418 }
0x1400   :  { %v992_v31 = vmul.f32 %v1419_v28, %v899_v15 }
0x1460   :  { %v995_v29 = vpop.permute.xlu1 %994 }
0x1461   :  { %v997_v30 = vmul.f32 %v1419_v28, %v995_v29 }
0x1463   :  { %999 = vrot.lane.b32.xlu0 %v997_v30, %s1585_s17 }
0x14d5   :  { %v1000_v32 = vpop.permute.xlu0 %999 }
0x14d6   :  { %v1002_v33 = vadd.f32 %v1000_v32, %v992_v31 }
0x14d8   :  { %1420 = vtanh.f32 %v1002_v33 }
0x14e5   :  { %v1421_v34 = vpop.eup %1420 }
0x14e6   :  { %1005 = vrot.lane.b32.xlu1 %v1421_v34, %s1584_s14 }
0x1558   :  { %v1006_v39 = vpop.permute.xlu1 %1005 }
0x1559   :  { %v1008_v40 = vmul.f32 %v1419_v28, %v1006_v39 }
0x155b   :  { %1010 = vrot.lane.b32.xlu0 %v1008_v40, %s1585_s17 }
0x15cd   :  { %v1011_v41 = vpop.permute.xlu0 %1010 }
0x15ce   :  { %1013 = vst.msk [vmem:[#allocation3 + $0x7] sm:$0x1] %vm291_vm3, %v1011_v41  ;;  %1014 = vst.msk [vmem:[#allocation13] sm:$0x1] %vm291_vm3, %v1011_v41 }
0x15d5   :  { %v1020_v42 = vld [vmem:[#allocation3] sm:$0xff] }
0x15d6   :  { %1342 = vmatmul.mubr.msk.f32.vlgmr.msra.gmra.mxu1 %vm180_vm2, %v1020_v42 }
0x1696   :  { %v1101_v0 = vpop.f32.mrf.mxu1 }
0x1697   :  { %v1102_v46 = vadd.f32 %v1185_v45, %v1101_v0 }
0x1698   :  { %v1343_v47 = vpop.f32.mrf.mxu1 }
0x1699   :  { %v1119_v48 = vsel %vm1118_vm4, %v1102_v46, 0.0  ;;  %v1108_v49 = vsel %vm1107_vm5, %v1102_v46, -1e+30 }
0x169a   :  { %1109 = vmax.xlane.f32.xlu1 %v1108_v49 }
0x1723   :  { %v1110_v50 = vpop.xlane.xlu1 %1109 }
0x1724   :  { %v1111_v3 = vsub.f32 %v1108_v49, %v1110_v50 }
0x1726   :  { %v1112_v51 = vmul.f32 1.442695, %v1111_v3 }
0x1728   :  { %1422 = vpow2.f32 %v1112_v51 }
0x1735   :  { %v1423_v52 = vpop.eup %1422 }
0x1736   :  { %1114 = vadd.xlane.f32.xlu0 %v1423_v52 }
0x1737   :  { %1517 = shalt.err (!%p1514_p10)
}
0x1738   :  { %1141 = dma.vmem_to_hbm [thread:$0]  %s1139_s19, 16, %s1847_s9, [#allocation14]  }
0x1739   :  { %s1587_s23 = smov 96   ;;  %s1588_s24 = smov [#allocation15]  }
0x173a   :  { %s1148_s25 = sshll.u32 %s1588_s24, 4  ;;  %s1149_s25 = int_to_ptr.vmem [resolvable:$true] %s1148_s25 }
0x173b   :  { %s1526_s26 = scalar_lea.vmem %s1149_s25, 16  ;;  %s1530_s27 = scalar_lea.vmem %s1149_s25, 32 }
0x173c   :  { %p1527_p11 = scmp.ne.s32.totalorder %s1149_s25, %s1526_s26  ;;  %p1531_p12 = scmp.lt.s32.totalorder %s1149_s25, %s1149_s25 }
0x173d   :  { %p1532_p13 = scmp.lt.s32.totalorder %s1530_s27, %s1526_s26 }
0x173f   :  { %p1533_p0 = por %p1532_p13, %p1531_p12 }
0x1741   :  { %p1534_p1 = pnand %p1533_p0, %p1527_p11 }
0x174c   :  { %1016 = vrot.lane.b32.xlu0 %v1002_v33, %s1587_s23 }
0x17bf   :  { %v1115_v4 = vpop.xlane.xlu0 %1114 }
0x17c0   :  { %1424 = vrcp.f32 %v1115_v4 }
0x17c3   :  { %v1017_v53 = vpop.permute.xlu0 %1016 }
0x17c4   :  { %1019 = vst.msk [vmem:[#allocation15] sm:$0x1] %vm291_vm3, %v1017_v53 }
0x17c5   :  { %1537 = shalt.err (!%p1534_p1)
}
0x17c6   :  { %1151 = dma.vmem_to_hbm [thread:$0]  %s1149_s25, 16, %s1848_s10, [#allocation14]  }
0x17c7   :  { %s1589_s28 = smov [#allocation12]  }
0x17c8   :  { %s1128_s29 = sshll.u32 %s1589_s28, 4  ;;  %s1129_s29 = int_to_ptr.vmem [resolvable:$true] %s1128_s29 }
0x17c9   :  { %s1546_s30 = scalar_lea.vmem %s1129_s29, 128  ;;  %p1551_p3 = scmp.lt.s32.totalorder %s1129_s29, %s1129_s29 }
0x17ca   :  { %p1547_p2 = scmp.ne.s32.totalorder %s1129_s29, %s1546_s30  ;;  %p1552_p4 = scmp.lt.s32.totalorder %s1546_s30, %s1546_s30 }
0x17cc   :  { %p1553_p5 = por %p1552_p4, %p1551_p3 }
0x17cd   :  { %v1425_v54 = vpop.eup %1424 }
0x17ce   :  { %v1117_v7 = vmul.f32 %v1425_v54, %v1423_v52  ;;  %p1554_p6 = pnand %p1553_p5, %p1547_p2 }
0x17d0   :  { %v1120_v55 = vadd.f32 %v1119_v48, %v1117_v7 }
0x17d2   :  { %1121 = vst [vmem:[#allocation12] sm:$0xff] %v1120_v55 }
0x17d3   :  { %1557 = shalt.err (!%p1554_p6)
}
0x17d4   :  { %1131 = dma.vmem_to_hbm [thread:$0]  %s1129_s29, 128, %s1846_s8, [#allocation6]  }
0x17d5   :  { %1572 = dma.done.wait [#allocation6], 128  }
0x17d6   :  { %1573 = vsyncadd [#allocation6], 4294967168 }
0x17d7   :  { %1574 = dma.done.wait [#allocation14], 32  }
0x17d8   :  { %1575 = vsyncadd [#allocation14], 4294967264 }
0x17d9   :  { %1161 = vsyncpa [#allocation5], 1 }
0x17da   :  { %1162 = vsyncpa [#allocation8], 1 }
0x17db   :  { %1163 = vsyncpa [#allocation11], 1 }
0x17dc   :  { %1164 = vsyncpa [#allocation6], 1 }
0x17dd   :  { %1165 = vsyncpa [#allocation14], 1 }

</bundles_post_ra>
